<compile_context>
chip_gen: v6e
topology: v6e:2x2x1
jax: 0.10.0
libtpu: 0.0.40
codegen_flags: <defaults>
</compile_context>

<pallas_src>
import jax
import jax.numpy as jnp
from jax.experimental import pallas as pl
from jax.experimental.pallas import tpu as pltpu


def _modal_map_attn_kernel(bm_ref, sf_ref, af_ref,
                           w_bm_ref, w_sf_ref, w_af_ref, b_ref, o_ref):
    # bm_ref: (1, D,  Tt)   self_bm tile (NCT)
    # sf_ref: (1, Cs, Tt)   self_features tile
    # af_ref: (1, Ca, Tt)   another_features tile
    # w_*  : (D, C_i)       conv weights with the 1/3 mean folded in
    # b_ref: (D, 1)         combined bias * 1/3 (f32)
    # o_ref: (1, D, Tt)
    acc = jnp.dot(w_bm_ref[...], bm_ref[0], preferred_element_type=jnp.float32)
    acc = acc + jnp.dot(w_sf_ref[...], sf_ref[0], preferred_element_type=jnp.float32)
    acc = acc + jnp.dot(w_af_ref[...], af_ref[0], preferred_element_type=jnp.float32)
    acc = acc + b_ref[...]                      # (D,1) broadcasts over the T lanes
    o_ref[0] = jax.nn.sigmoid(acc).astype(o_ref.dtype)


def prepare_params(params, compute_dtype=jnp.float32):
    """One-time parameter prep (outside the per-call path).

    Converts the three Conv1d(k=1) weights (out, in, 1) into (out, in) matmul weights,
    folds the 1/3 mean into both weights and the combined bias, and casts weights to
    the storage/compute dtype (bias stays f32 -- bias add + sigmoid run in f32).
    """
    w_bm, b_bm = params["attn_from_bm"]          # (D, D, 1), (D,)
    w_sf, b_sf = params["attn_from_self"]        # (D, Cs, 1), (D,)
    w_af, b_af = params["attn_from_another"]     # (D, Ca, 1), (D,)
    third = jnp.float32(1.0 / 3.0)
    W_bm = (w_bm[:, :, 0] * third).astype(compute_dtype)
    W_sf = (w_sf[:, :, 0] * third).astype(compute_dtype)
    W_af = (w_af[:, :, 0] * third).astype(compute_dtype)
    bias = ((b_bm + b_sf + b_af) * third).astype(jnp.float32).reshape(-1, 1)   # (D, 1)
    return W_bm, W_sf, W_af, bias


def _pick_t_tiling(T, t_tile_max):
    """Choose (T_pad, t_tile): t_tile divides T_pad, T_pad >= T, pad only when needed."""
    if T % 128 != 0 and T <= t_tile_max:
        return T, T                              # single full-T block (legal: equals array dim)
    T_pad = pl.cdiv(T, 128) * 128
    tile = max(128, min(t_tile_max - t_tile_max % 128, T_pad))
    while T_pad % tile != 0:
        tile -= 128
    return T_pad, tile


def modal_map_attn_block(self_bm, self_features, another_features, prepared, *,
                         t_tile_max=2048):
    """Inputs in PyTorch NCT layout; returns NCT output (B, max_duration, T)."""
    W_bm, W_sf, W_af, bias = prepared
    B, D, T = self_bm.shape                      # D == max_duration
    Cs = self_features.shape[1]
    Ca = another_features.shape[1]
    cdt = W_bm.dtype                             # storage/compute dtype (f32 or bf16)

    T_pad, t_tile = _pick_t_tiling(T, t_tile_max)

    bm = self_bm.astype(cdt)
    sf = self_features.astype(cdt)
    af = another_features.astype(cdt)
    if T_pad != T:                               # rare: large T not a lane multiple
        pad = ((0, 0), (0, 0), (0, T_pad - T))
        bm, sf, af = jnp.pad(bm, pad), jnp.pad(sf, pad), jnp.pad(af, pad)

    grid = (B, T_pad // t_tile)
    isz = jnp.dtype(cdt).itemsize
    cost = pl.CostEstimate(
        flops=2 * B * T_pad * D * (D + Cs + Ca),
        transcendentals=B * T_pad * D,
        bytes_accessed=isz * (B * T_pad * (D + Cs + Ca)      # activations
                              + D * (D + Cs + Ca)            # weights
                              + B * T_pad * D)               # output
                       + 4 * D,                              # f32 bias
    )

    out = pl.pallas_call(
        _modal_map_attn_kernel,
        out_shape=jax.ShapeDtypeStruct((B, D, T_pad), cdt),
        grid_spec=pl.GridSpec(
            grid=grid,
            in_specs=[
                pl.BlockSpec((1, D, t_tile), lambda b, t: (b, 0, t)),
                pl.BlockSpec((1, Cs, t_tile), lambda b, t: (b, 0, t)),
                pl.BlockSpec((1, Ca, t_tile), lambda b, t: (b, 0, t)),
                pl.BlockSpec((D, D), lambda b, t: (0, 0)),
                pl.BlockSpec((D, Cs), lambda b, t: (0, 0)),
                pl.BlockSpec((D, Ca), lambda b, t: (0, 0)),
                pl.BlockSpec((D, 1), lambda b, t: (0, 0)),
            ],
            out_specs=pl.BlockSpec((1, D, t_tile), lambda b, t: (b, 0, t)),
        ),
        compiler_params=pltpu.CompilerParams(
            dimension_semantics=("parallel", "parallel")),
        cost_estimate=cost,
    )(bm, sf, af, W_bm, W_sf, W_af, bias)

    if T_pad != T:
        out = out[:, :, :T]
    return out


def init_params(key, n_self_features, n_another_features, max_duration):
    """Deterministic synthetic init matching Conv1d(k=1) parameter shapes."""
    k1, k2, k3, k4, k5, k6 = jax.random.split(key, 6)
    D = max_duration
    return {
        "attn_from_bm": (
            0.1 * jax.random.normal(k1, (D, D, 1), jnp.float32),
            0.1 * jax.random.normal(k2, (D,), jnp.float32),
        ),
        "attn_from_self": (
            0.1 * jax.random.normal(k3, (D, n_self_features, 1), jnp.float32),
            0.1 * jax.random.normal(k4, (D,), jnp.float32),
        ),
        "attn_from_another": (
            0.1 * jax.random.normal(k5, (D, n_another_features, 1), jnp.float32),
            0.1 * jax.random.normal(k6, (D,), jnp.float32),
        ),
    }


def _reference(self_bm, self_features, another_features, params):
    """Pure-JAX reference of the PyTorch forward."""
    def conv1d_k1(x, w, b):  # x: (B, Cin, T), w: (Cout, Cin, 1), b: (Cout,)
        return jnp.einsum("bct,oc->bot", x, w[:, :, 0]) + b[None, :, None]

    w_bm = conv1d_k1(self_bm, *params["attn_from_bm"])
    w_sf = conv1d_k1(self_features, *params["attn_from_self"])
    w_af = conv1d_k1(another_features, *params["attn_from_another"])
    w = jnp.stack((w_bm, w_sf, w_af), axis=3).mean(axis=3)
    return jax.nn.sigmoid(w)


if __name__ == "__main__":
    key = jax.random.PRNGKey(0)
    B = 2
    max_duration = 40      # output channels of every branch (== self_bm channels)
    n_self_features = 32
    n_another_features = 24

    kp, k_bm, k_sf, k_af = jax.random.split(key, 4)
    params = init_params(kp, n_self_features, n_another_features, max_duration)
    fwd = jax.jit(modal_map_attn_block, static_argnames=("t_tile_max",))

    # --- Check 1: f32, small T (single full-T block per batch) ---------------------
    T = 16
    self_bm = jax.random.normal(k_bm, (B, max_duration, T), jnp.float32)
    self_features = jax.random.normal(k_sf, (B, n_self_features, T), jnp.float32)
    another_features = jax.random.normal(k_af, (B, n_another_features, T), jnp.float32)

    prepared_f32 = jax.block_until_ready(prepare_params(params, jnp.float32))
    out = jax.block_until_ready(fwd(self_bm, self_features, another_features, prepared_f32))
    ref = _reference(self_bm, self_features, another_features, params)
    assert out.shape == (B, max_duration, T)
    assert jnp.allclose(out, ref, atol=1e-5, rtol=1e-5)

    # --- Check 2: bf16 storage, larger T (tiled lane axis, 2x2 parallel grid) ------
    T2 = 256
    bm2 = jax.random.normal(k_bm, (B, max_duration, T2), jnp.float32)
    sf2 = jax.random.normal(k_sf, (B, n_self_features, T2), jnp.float32)
    af2 = jax.random.normal(k_af, (B, n_another_features, T2), jnp.float32)
    prepared_bf16 = jax.block_until_ready(prepare_params(params, jnp.bfloat16))
    out2 = fwd(bm2.astype(jnp.bfloat16), sf2.astype(jnp.bfloat16),
               af2.astype(jnp.bfloat16), prepared_bf16, t_tile_max=128)
    out2 = jax.block_until_ready(out2)
    ref2 = _reference(bm2, sf2, af2, params)
    assert out2.shape == (B, max_duration, T2)
    assert jnp.allclose(out2.astype(jnp.float32), ref2, atol=2e-2)

    print("KERNEL_OK")
</pallas_src>

<mosaic_0001>
module attributes {stable_mosaic.version = 11 : i64} {
  func.func @_modal_map_attn_kernel(%arg0: i32, %arg1: i32, %arg2: memref<1x40x16xf32, #tpu.memory_space<vmem>>, %arg3: memref<1x32x16xf32, #tpu.memory_space<vmem>>, %arg4: memref<1x24x16xf32, #tpu.memory_space<vmem>>, %arg5: memref<40x40xf32, #tpu.memory_space<vmem>>, %arg6: memref<40x32xf32, #tpu.memory_space<vmem>>, %arg7: memref<40x24xf32, #tpu.memory_space<vmem>>, %arg8: memref<40x1xf32, #tpu.memory_space<vmem>>, %arg9: memref<1x40x16xf32, #tpu.memory_space<vmem>>) attributes {dimension_semantics = [#tpu.dimension_semantics<parallel>, #tpu.dimension_semantics<parallel>], iteration_bounds = array<i64: 2, 1>, scalar_prefetch = 0 : i64, scratch_operands = 0 : i64, tpu.core_type = #tpu.core_type<tc>, window_params = [{transform_indices = @transform_0, window_bounds = array<i64: 1, 40, 16>}, {transform_indices = @transform_1, window_bounds = array<i64: 1, 32, 16>}, {transform_indices = @transform_2, window_bounds = array<i64: 1, 24, 16>}, {pipeline_mode = #tpu.pipeline_mode<synchronous>, transform_indices = @transform_3, window_bounds = array<i64: 40, 40>}, {pipeline_mode = #tpu.pipeline_mode<synchronous>, transform_indices = @transform_4, window_bounds = array<i64: 40, 32>}, {pipeline_mode = #tpu.pipeline_mode<synchronous>, transform_indices = @transform_5, window_bounds = array<i64: 40, 24>}, {pipeline_mode = #tpu.pipeline_mode<synchronous>, transform_indices = @transform_6, window_bounds = array<i64: 40, 1>}, {transform_indices = @transform_7, window_bounds = array<i64: 1, 40, 16>}]} {
    %c0 = arith.constant 0 : index
    %c0_0 = arith.constant 0 : index
    %0 = vector.load %arg5[%c0, %c0_0] : memref<40x40xf32, #tpu.memory_space<vmem>>, vector<40x40xf32>
    %c0_1 = arith.constant 0 : index
    %c0_2 = arith.constant 0 : index
    %c0_3 = arith.constant 0 : index
    %1 = vector.load %arg2[%c0_1, %c0_2, %c0_3] : memref<1x40x16xf32, #tpu.memory_space<vmem>>, vector<1x40x16xf32>
    %2 = vector.shape_cast %1 : vector<1x40x16xf32> to vector<40x16xf32>
    %cst = arith.constant dense<0.000000e+00> : vector<40x16xf32>
    %3 = tpu.matmul %0, %2, %cst {dimension_numbers = #tpu.dot_dimension_numbers<[1], [0], [0], [1], [0, 0, 1, 1], [], []>} : vector<40x40xf32>, vector<40x16xf32>, vector<40x16xf32> -> vector<40x16xf32>
    %c0_4 = arith.constant 0 : index
    %c0_5 = arith.constant 0 : index
    %4 = vector.load %arg6[%c0_4, %c0_5] : memref<40x32xf32, #tpu.memory_space<vmem>>, vector<40x32xf32>
    %c0_6 = arith.constant 0 : index
    %c0_7 = arith.constant 0 : index
    %c0_8 = arith.constant 0 : index
    %5 = vector.load %arg3[%c0_6, %c0_7, %c0_8] : memref<1x32x16xf32, #tpu.memory_space<vmem>>, vector<1x32x16xf32>
    %6 = vector.shape_cast %5 : vector<1x32x16xf32> to vector<32x16xf32>
    %cst_9 = arith.constant dense<0.000000e+00> : vector<40x16xf32>
    %7 = tpu.matmul %4, %6, %cst_9 {dimension_numbers = #tpu.dot_dimension_numbers<[1], [0], [0], [1], [0, 0, 1, 1], [], []>} : vector<40x32xf32>, vector<32x16xf32>, vector<40x16xf32> -> vector<40x16xf32>
    %8 = arith.addf %3, %7 : vector<40x16xf32>
    %c0_10 = arith.constant 0 : index
    %c0_11 = arith.constant 0 : index
    %9 = vector.load %arg7[%c0_10, %c0_11] : memref<40x24xf32, #tpu.memory_space<vmem>>, vector<40x24xf32>
    %c0_12 = arith.constant 0 : index
    %c0_13 = arith.constant 0 : index
    %c0_14 = arith.constant 0 : index
    %10 = vector.load %arg4[%c0_12, %c0_13, %c0_14] : memref<1x24x16xf32, #tpu.memory_space<vmem>>, vector<1x24x16xf32>
    %11 = vector.shape_cast %10 : vector<1x24x16xf32> to vector<24x16xf32>
    %cst_15 = arith.constant dense<0.000000e+00> : vector<40x16xf32>
    %12 = tpu.matmul %9, %11, %cst_15 {dimension_numbers = #tpu.dot_dimension_numbers<[1], [0], [0], [1], [0, 0, 1, 1], [], []>} : vector<40x24xf32>, vector<24x16xf32>, vector<40x16xf32> -> vector<40x16xf32>
    %13 = arith.addf %8, %12 : vector<40x16xf32>
    %c0_16 = arith.constant 0 : index
    %c0_17 = arith.constant 0 : index
    %14 = vector.load %arg8[%c0_16, %c0_17] : memref<40x1xf32, #tpu.memory_space<vmem>>, vector<40x1xf32>
    %15 = vector.broadcast %14 : vector<40x1xf32> to vector<40x16xf32>
    %16 = arith.addf %13, %15 : vector<40x16xf32>
    %17 = arith.negf %16 : vector<40x16xf32>
    %18 = math.exp %17 : vector<40x16xf32>
    %cst_18 = arith.constant 1.000000e+00 : f32
    %19 = vector.broadcast %cst_18 : f32 to vector<40x16xf32>
    %20 = arith.addf %19, %18 : vector<40x16xf32>
    %21 = arith.divf %19, %20 : vector<40x16xf32>
    %c0_19 = arith.constant 0 : index
    %c0_20 = arith.constant 0 : index
    %c0_21 = arith.constant 0 : index
    %22 = vector.load %arg9[%c0_19, %c0_20, %c0_21] : memref<1x40x16xf32, #tpu.memory_space<vmem>>, vector<1x40x16xf32>
    %23 = vector.shape_cast %22 : vector<1x40x16xf32> to vector<40x16xf32>
    %24 = vector.shape_cast %21 : vector<40x16xf32> to vector<1x40x16xf32>
    tpu.vector_store %arg9[%c0_19, %c0_20, %c0_21], %24 {strides = array<i32>} : memref<1x40x16xf32, #tpu.memory_space<vmem>>, vector<1x40x16xf32>,
    return
  }
  func.func @transform_0(%arg0: i32, %arg1: i32) -> (i32, i32, i32) {
    %c0_i32 = arith.constant 0 : i32
    %c0_i32_0 = arith.constant 0 : i32
    return %arg0, %c0_i32, %arg1 : i32, i32, i32
  }
  func.func @transform_1(%arg0: i32, %arg1: i32) -> (i32, i32, i32) {
    %c0_i32 = arith.constant 0 : i32
    %c0_i32_0 = arith.constant 0 : i32
    return %arg0, %c0_i32, %arg1 : i32, i32, i32
  }
  func.func @transform_2(%arg0: i32, %arg1: i32) -> (i32, i32, i32) {
    %c0_i32 = arith.constant 0 : i32
    %c0_i32_0 = arith.constant 0 : i32
    return %arg0, %c0_i32, %arg1 : i32, i32, i32
  }
  func.func @transform_3(%arg0: i32, %arg1: i32) -> (i32, i32) {
    %c0_i32 = arith.constant 0 : i32
    %c0_i32_0 = arith.constant 0 : i32
    %c0_i32_1 = arith.constant 0 : i32
    return %c0_i32, %c0_i32_0 : i32, i32
  }
  func.func @transform_4(%arg0: i32, %arg1: i32) -> (i32, i32) {
    %c0_i32 = arith.constant 0 : i32
    %c0_i32_0 = arith.constant 0 : i32
    %c0_i32_1 = arith.constant 0 : i32
    return %c0_i32, %c0_i32_0 : i32, i32
  }
  func.func @transform_5(%arg0: i32, %arg1: i32) -> (i32, i32) {
    %c0_i32 = arith.constant 0 : i32
    %c0_i32_0 = arith.constant 0 : i32
    %c0_i32_1 = arith.constant 0 : i32
    return %c0_i32, %c0_i32_0 : i32, i32
  }
  func.func @transform_6(%arg0: i32, %arg1: i32) -> (i32, i32) {
    %c0_i32 = arith.constant 0 : i32
    %c0_i32_0 = arith.constant 0 : i32
    %c0_i32_1 = arith.constant 0 : i32
    return %c0_i32, %c0_i32_0 : i32, i32
  }
  func.func @transform_7(%arg0: i32, %arg1: i32) -> (i32, i32, i32) {
    %c0_i32 = arith.constant 0 : i32
    %c0_i32_0 = arith.constant 0 : i32
    return %arg0, %c0_i32, %arg1 : i32, i32, i32
  }
}

</mosaic_0001>

<bundles_post_ra>
// kernel: modal_map_attn_block.1
= control target key start
LH: loop header
LB: loop body
LE: loop exit
PB: predicated region body
PF: predicated region fallthrough
CT: control target
= control target key end

     0   :  { %s1167_s24 = smov 0   ;;  %s1169_s25 = smov 0   ;;  %s1343_s0 = inlined_call_operand.vmem [shape: f32[2,40,16], index: 0, kind: input, shape index: {}]   ;;  %s1344_s1 = inlined_call_operand.vmem [shape: f32[2,32,16], index: 1, kind: input, shape index: {}]   ;;  %s1345_s2 = inlined_call_operand.vmem [shape: f32[2,24,16], index: 2, kind: input, shape index: {}]   ;;  %s1346_s3 = inlined_call_operand.vmem [shape: f32[40,40], index: 3, kind: input, shape index: {}]   ;;  %s1347_s4 = inlined_call_operand.vmem [shape: f32[40,32], index: 4, kind: input, shape index: {}]   ;;  %s1348_s5 = inlined_call_operand.vmem [shape: f32[40,24], index: 5, kind: input, shape index: {}]   ;;  %s1349_s6 = inlined_call_operand.vmem [shape: f32[40,1], index: 6, kind: input, shape index: {}]   ;;  %s1350_s7 = inlined_call_operand.vmem [shape: f32[2,40,16], index: 7, kind: output, shape index: {}]  }
   0x1   :  { %s1171_s26 = smov 0  }
   0x2 LB: > { %s29_s27 = sadd.s32 1, %s1118_s25  ;;  %p916_p0 = scmp.ge.s32.totalorder %s1122_s26, 1  ;;  %s1122_s26 = sphi %s1171_s26, %s17_s26   ;;  %s1118_s25 = sphi %s1169_s25, %s1352_s25   ;;  %s1114_s24 = sphi %s1167_s24, %s1351_s24  }
   0x3   : > { %p31_p1 = scmp.ge.s32.totalorder %s29_s27, 2  ;;  %p286_p2 = scmp.lt.s32.totalorder %s1122_s26, 3 }
   0x5   : > { %s1354_s27 = smov (%p31_p1, %s29_s27), 0  ;;  %p287_p3 = pnand %p916_p0, %p286_p2 }
   0x6   : > { %p340_p4 = scmp.lt.s32.totalorder (!%p287_p3), %s1114_s24, 1 }
   0x7   : > { %290 = sbr.rel (%p287_p3) target bundleno = 285 (0x11d), region = 48 }
   0xc   : > { %v1124_v0 = vmov 0.0   ;;  %s1356_s24 = smov (!%p340_p4, %s1114_s24), 1  ;;  %vm1125_vm0 = vmmov 0   ;;  %v1126_v1 = vmov 0   ;;  %v722_v2 = vld [vmem:[%s1349_s6] sm:$0xff]  ;;  %v384_v7 = vld [vmem:[%s1347_s4 + $0x10] sm:$0xff] }
   0xd   : > { %1041 = vmatprep.subr.mxu1 %v1124_v0  ;;  %972 = vmatprep.subr.mxu0 %v1124_v0  ;;  %s944_s28 = sshll.u32 %s1356_s24, 5  ;;  %s1049_s9 = smul.u32 40, %s1356_s24  ;;  %vm391_vm1 = vcmask 261120   ;;  %v382_v9 = vld [vmem:[%s1347_s4] sm:$0xff]  ;;  %v385_v11 = vld [vmem:[%s1347_s4 + $0x18] sm:$0xff]  ;;  %v383_v14 = vld [vmem:[%s1347_s4 + $0x8] sm:$0xff] }
   0xe   : > { %986 = vmatprep.mubr.msk.f32.mxu1 %vm1125_vm0, %v1124_v0  ;;  %980 = vmatprep.mubr.msk.f32.mxu0 %vm1125_vm0, %v1124_v0  ;;  %s355_s8 = scalar_lea.vmem %s1344_s1, %s944_s28  ;;  %s1050_s15 = smul.u32 24, %s1356_s24  ;;  %v386_v15 = vld [vmem:[%s1347_s4 + $0x20] sm:$0xff]  ;;  %vm497_vm2 = vcmask 326656   ;;  %vm611_vm3 = vcmask 195584   ;;  %v723_v22 = vld [vmem:[%s1349_s6 + $0x8] sm:$0xff]  ;;  %v724_v23 = vld [vmem:[%s1349_s6 + $0x10] sm:$0xff] }
   0xf   : > { %1078 = vset.pattern.permute.xlu0 %v1126_v1  ;;  %1079 = vset.pattern.permute.xlu1 %v1126_v1  ;;  %v390_v3 = vld [vmem:[%s355_s8 + $0x18] sm:$0xff]  ;;  %v389_v4 = vld [vmem:[%s355_s8 + $0x10] sm:$0xff]  ;;  %v388_v5 = vld [vmem:[%s355_s8 + $0x8] sm:$0xff]  ;;  %s1208_s14 = scalar_lea.vmem %s1343_s0, %s1049_s9  ;;  %s371_s23 = scalar_lea.vmem %s1350_s7, %s1049_s9  ;;  %vm787_vm4 = vcmask 130048  }
  0x10   : > { %729 = vperm.xlu0 %1078, %v722_v2   ;;  %1045 = vmatpush3.msra.mxu1 %v390_v3  ;;  %v387_v6 = vld [vmem:[%s355_s8] sm:$0xff]  ;;  %v380_v10 = vld [vmem:[%s1208_s14 + $0x18] sm:$0xff]  ;;  %s363_s22 = scalar_lea.vmem %s1345_s2, %s1050_s15  ;;  %v379_v12 = vld [vmem:[%s1208_s14 + $0x10] sm:$0xff] }
  0x11   : > { %973 = vmatpush3.msra.mxu0 %v390_v3  ;;  %1042 = vmatprep.subr.mxu1 %v1124_v0  ;;  %v381_v8 = vld [vmem:[%s1208_s14 + $0x20] sm:$0xff]  ;;  %v610_v13 = vld [vmem:[%s363_s22 + $0x10] sm:$0xff]  ;;  %v378_v16 = vld [vmem:[%s1208_s14 + $0x8] sm:$0xff] }
  0x12   : > { %974 = vmatprep.subr.mxu0 %v1124_v0  ;;  %1046 = vmatpush3.msra.mxu1 %v389_v4  ;;  %v609_v17 = vld [vmem:[%s363_s22 + $0x8] sm:$0xff]  ;;  %v377_v18 = vld [vmem:[%s1208_s14] sm:$0xff]  ;;  %v725_v27 = vld [vmem:[%s1349_s6 + $0x18] sm:$0xff] }
  0x13   : > { %975 = vmatpush3.msra.mxu0 %v389_v4  ;;  %1043 = vmatprep.subr.mxu1 %v1124_v0  ;;  %v372_v19 = vld [vmem:[%s1346_s3] sm:$0xff]  ;;  %v373_v24 = vld [vmem:[%s1346_s3 + $0x8] sm:$0xff]  ;;  %v374_v28 = vld [vmem:[%s1346_s3 + $0x10] sm:$0xff] }
  0x14   : > { %976 = vmatprep.subr.mxu0 %v1124_v0  ;;  %1047 = vmatpush3.msra.mxu1 %v388_v5  ;;  %v608_v20 = vld [vmem:[%s363_s22] sm:$0xff]  ;;  %v604_v25 = vld [vmem:[%s1348_s5 + $0x8] sm:$0xff]  ;;  %v605_v29 = vld [vmem:[%s1348_s5 + $0x10] sm:$0xff] }
  0x15   : > { %977 = vmatpush3.msra.mxu0 %v388_v5  ;;  %1044 = vmatprep.subr.mxu1 %v1124_v0  ;;  %v603_v21 = vld [vmem:[%s1348_s5] sm:$0xff]  ;;  %v375_v30 = vld [vmem:[%s1346_s3 + $0x18] sm:$0xff] }
  0x16   : > { %978 = vmatprep.subr.mxu0 %v1124_v0  ;;  %1048 = vmatpush3.msra.mxu1 %v387_v6  ;;  %v726_v26 = vld [vmem:[%s1349_s6 + $0x20] sm:$0xff]  ;;  %v606_v31 = vld [vmem:[%s1348_s5 + $0x18] sm:$0xff] }
  0x17   : > { %979 = vmatpush3.msra.mxu0 %v387_v6  ;;  %987 = vmatmul.mubr.msk.f32.vlgmr.msra.gmra.mxu1 %vm391_vm1, %v384_v7  ;;  %v376_v32 = vld [vmem:[%s1346_s3 + $0x20] sm:$0xff] }
  0x18   : > { %995 = vmatprep.subr.mxu1 %v1124_v0  ;;  %989 = vmatprep.mubr.msk.f32.mxu1 %vm1125_vm0, %v1124_v0  ;;  %v607_v33 = vld [vmem:[%s1348_s5 + $0x20] sm:$0xff] }
  0x19   : > { %996 = vmatpush3.msra.mxu1 %v381_v8  ;;  %981 = vmatmul.mubr.msk.f32.vlgmr.msra.gmra.mxu0 %vm391_vm1, %v382_v9 }
  0x1a   : > { %997 = vmatprep.subr.mxu1 %v1124_v0  ;;  %1020 = vmatprep.subr.mxu0 %v1124_v0 }
  0x1b   : > { %998 = vmatpush3.msra.mxu1 %v380_v10  ;;  %1021 = vmatpush3.msra.mxu0 %v610_v13 }
  0x1c   : > { %990 = vmatmul.mubr.msk.f32.gmra.mxu1 %vm391_vm1, %v385_v11  ;;  %999 = vmatprep.subr.mxu1 %v1124_v0 }
  0x1d   : > { %1000 = vmatpush3.msra.mxu1 %v379_v12  ;;  %992 = vmatprep.mubr.msk.f32.mxu1 %vm1125_vm0, %v1124_v0 }
  0x1e   : > { %983 = vmatprep.mubr.msk.f32.mxu0 %vm1125_vm0, %v1124_v0  ;;  %1001 = vmatprep.subr.mxu1 %v1124_v0 }
  0x1f   : > { %984 = vmatmul.mubr.msk.f32.gmra.mxu0 %vm391_vm1, %v383_v14  ;;  %1022 = vmatprep.subr.mxu0 %v1124_v0 }
  0x20   : > { %993 = vmatmul.mubr.msk.f32.gmra.mxu1 %vm391_vm1, %v386_v15  ;;  %1023 = vmatpush3.msra.mxu0 %v609_v17 }
  0x21   : > { %1002 = vmatpush3.msra.mxu1 %v378_v16  ;;  %1005 = vmatprep.mubr.msk.f32.mxu1 %vm1125_vm0, %v1124_v0 }
  0x22   : > { %1003 = vmatprep.subr.mxu1 %v1124_v0  ;;  %1024 = vmatprep.subr.mxu0 %v1124_v0 }
  0x23   : > { %1004 = vmatpush3.msra.mxu1 %v377_v18  ;;  %1025 = vmatpush3.msra.mxu0 %v608_v20 }
  0x24   : > { %1006 = vmatmul.mubr.msk.f32.vlgmr.msra.gmra.mxu1 %vm497_vm2, %v372_v19  ;;  %1026 = vmatprep.mubr.msk.f32.mxu0 %vm1125_vm0, %v1124_v0 }
  0x25   : > { %1008 = vmatprep.mubr.msk.f32.mxu1 %vm1125_vm0, %v1124_v0  ;;  %1027 = vmatmul.mubr.msk.f32.vlgmr.msra.gmra.mxu0 %vm611_vm3, %v603_v21 }
  0x26   : > { %734 = vperm.xlu0 %1078, %v723_v22   ;;  %1029 = vmatprep.mubr.msk.f32.mxu0 %vm1125_vm0, %v1124_v0 }
  0x27   : > { %739 = vperm.xlu1 %1079, %v724_v23  }
  0x28   : > { %1009 = vmatmul.mubr.msk.f32.gmra.mxu1 %vm497_vm2, %v373_v24 }
  0x29   : > { %1011 = vmatprep.mubr.msk.f32.mxu1 %vm1125_vm0, %v1124_v0  ;;  %1030 = vmatmul.mubr.msk.f32.gmra.mxu0 %vm611_vm3, %v604_v25 }
  0x2a   : > { %749 = vperm.xlu0 %1078, %v726_v26   ;;  %1032 = vmatprep.mubr.msk.f32.mxu0 %vm1125_vm0, %v1124_v0 }
  0x2b   : > { %744 = vperm.xlu1 %1079, %v725_v27  }
  0x2c   : > { %1012 = vmatmul.mubr.msk.f32.gmra.mxu1 %vm497_vm2, %v374_v28 }
  0x2d   : > { %1014 = vmatprep.mubr.msk.f32.mxu1 %vm1125_vm0, %v1124_v0  ;;  %1033 = vmatmul.mubr.msk.f32.gmra.mxu0 %vm611_vm3, %v605_v29 }
  0x2e   : > { %1035 = vmatprep.mubr.msk.f32.mxu0 %vm1125_vm0, %v1124_v0 }
  0x30   : > { %1015 = vmatmul.mubr.msk.f32.gmra.mxu1 %vm497_vm2, %v375_v30 }
  0x31   : > { %1017 = vmatprep.mubr.msk.f32.mxu1 %vm1125_vm0, %v1124_v0  ;;  %1036 = vmatmul.mubr.msk.f32.gmra.mxu0 %vm611_vm3, %v606_v31 }
  0x32   : > { %1038 = vmatprep.mubr.msk.f32.mxu0 %vm1125_vm0, %v1124_v0 }
  0x34   : > { %1018 = vmatmul.mubr.msk.f32.gmra.mxu1 %vm497_vm2, %v376_v32 }
  0x35   : > { %1039 = vmatmul.mubr.msk.f32.gmra.mxu0 %vm611_vm3, %v607_v33 }
  0x8b   : > { %v730_v44 = vpop.permute.xlu0 %729 }
  0xa1   : > { %v735_v54 = vpop.permute.xlu0 %734 }
  0xa2   : > { %v740_v59 = vpop.permute.xlu1 %739 }
  0xa5   : > { %v750_v21 = vpop.permute.xlu0 %749 }
  0xa6   : > { %v745_v8 = vpop.permute.xlu1 %744 }
  0xd7   : > { %v483_v34 = vpop.f32.mrf.mxu1 }
  0xd9   : > { %v988_v35 = vpop.f32.mrf.mxu1  ;;  %v473_v36 = vpop.f32.mrf.mxu0 }
  0xdb   : > { %v982_v38 = vpop.f32.mrf.mxu0 }
  0xdc   : > { %v488_v37 = vpop.f32.mrf.mxu1 }
  0xde   : > { %v991_v39 = vpop.f32.mrf.mxu1 }
  0xdf   : > { %v478_v40 = vpop.f32.mrf.mxu0 }
  0xe0   : > { %v493_v41 = vpop.f32.mrf.mxu1 }
  0xe1   : > { %v985_v42 = vpop.f32.mrf.mxu0 }
  0xe2   : > { %v994_v43 = vpop.f32.mrf.mxu1 }
  0xe4   : > { %v579_v45 = vpop.f32.mrf.mxu1 }
  0xe5   : > { %v580_v46 = vadd.f32 %v579_v45, %v473_v36  ;;  %v693_v47 = vpop.f32.mrf.mxu0 }
  0xe6   : > { %v1007_v48 = vpop.f32.mrf.mxu1 }
  0xe7   : > { %v717_v49 = vadd.f32 %v693_v47, %v580_v46  ;;  %v1028_v50 = vpop.f32.mrf.mxu0 }
  0xe8   : > { %v584_v51 = vpop.f32.mrf.mxu1 }
  0xe9   : > { %v752_v52 = vadd.f32 %v730_v44, %v717_v49  ;;  %v585_v53 = vadd.f32 %v584_v51, %v478_v40  ;;  %v698_v55 = vpop.f32.mrf.mxu0 }
  0xea   : > { %v1010_v56 = vpop.f32.mrf.mxu1 }
  0xeb   : > { %v937_v57 = vmul.f32 -1.442695, %v752_v52  ;;  %v718_v58 = vadd.f32 %v698_v55, %v585_v53  ;;  %v1031_v60 = vpop.f32.mrf.mxu0 }
  0xec   : > { %v589_v61 = vpop.f32.mrf.mxu1 }
  0xed   : > { %1080 = vpow2.f32 %v937_v57  ;;  %v753_v62 = vadd.f32 %v735_v54, %v718_v58  ;;  %v590_v63 = vadd.f32 %v589_v61, %v483_v34  ;;  %v703_v0 = vpop.f32.mrf.mxu0 }
  0xee   : > { %v1013_v1 = vpop.f32.mrf.mxu1 }
  0xef   : > { %v938_v2 = vmul.f32 -1.442695, %v753_v62  ;;  %v719_v3 = vadd.f32 %v703_v0, %v590_v63  ;;  %v1034_v4 = vpop.f32.mrf.mxu0 }
  0xf0   : > { %v594_v5 = vpop.f32.mrf.mxu1 }
  0xf1   : > { %1082 = vpow2.f32 %v938_v2  ;;  %v754_v6 = vadd.f32 %v740_v59, %v719_v3  ;;  %v595_v7 = vadd.f32 %v594_v5, %v488_v37  ;;  %v708_v9 = vpop.f32.mrf.mxu0 }
  0xf2   : > { %v1016_v10 = vpop.f32.mrf.mxu1 }
  0xf3   : > { %v939_v11 = vmul.f32 -1.442695, %v754_v6  ;;  %v720_v12 = vadd.f32 %v708_v9, %v595_v7  ;;  %v1037_v13 = vpop.f32.mrf.mxu0 }
  0xf4   : > { %v599_v14 = vpop.f32.mrf.mxu1 }
  0xf5   : > { %1084 = vpow2.f32 %v939_v11  ;;  %v755_v15 = vadd.f32 %v745_v8, %v720_v12  ;;  %v600_v16 = vadd.f32 %v599_v14, %v493_v41  ;;  %v713_v17 = vpop.f32.mrf.mxu0 }
  0xf6   : > { %v1019_v18 = vpop.f32.mrf.mxu1 }
  0xf7   : > { %v940_v19 = vmul.f32 -1.442695, %v755_v15  ;;  %v721_v20 = vadd.f32 %v713_v17, %v600_v16  ;;  %v1040_v22 = vpop.f32.mrf.mxu0 }
  0xf9   : > { %1086 = vpow2.f32 %v940_v19  ;;  %v756_v23 = vadd.f32 %v750_v21, %v721_v20 }
  0xfa   : > { %v1081_v24 = vpop.eup %1080 }
  0xfb   : > { %v772_v25 = vadd.f32 1.0, %v1081_v24  ;;  %v941_v26 = vmul.f32 -1.442695, %v756_v23 }
  0xfd   : > { %1088 = vrcp.f32 %v772_v25 }
  0xfe   : > { %v1083_v27 = vpop.eup %1082  ;;  %1090 = vpow2.f32 %v941_v26 }
  0xff   : > { %v773_v28 = vadd.f32 1.0, %v1083_v27 }
 0x101   : > { %1092 = vrcp.f32 %v773_v28 }
 0x102   : > { %v1085_v29 = vpop.eup %1084 }
 0x103   : > { %v774_v30 = vadd.f32 1.0, %v1085_v29 }
 0x105   : > { %1094 = vrcp.f32 %v774_v30 }
 0x106   : > { %v1087_v31 = vpop.eup %1086 }
 0x107   : > { %v775_v32 = vadd.f32 1.0, %v1087_v31 }
 0x109   : > { %1096 = vrcp.f32 %v775_v32 }
 0x10a   : > { %v1089_v33 = vpop.eup %1088 }
 0x10b   : > { %v1091_v34 = vpop.eup %1090  ;;  %788 = vst.msk [vmem:[%s371_s23] sm:$0xff] %vm787_vm4, %v1089_v33 }
 0x10c   : > { %v776_v35 = vadd.f32 1.0, %v1091_v34 }
 0x10e   : > { %v1093_v36 = vpop.eup %1092  ;;  %1098 = vrcp.f32 %v776_v35 }
 0x10f   : > { %789 = vst.msk [vmem:[%s371_s23 + $0x8] sm:$0xff] %vm787_vm4, %v1093_v36 }
 0x112   : > { %v1095_v37 = vpop.eup %1094 }
 0x113   : > { %790 = vst.msk [vmem:[%s371_s23 + $0x10] sm:$0xff] %vm787_vm4, %v1095_v37 }
 0x116   : > { %v1097_v38 = vpop.eup %1096 }
 0x117   : > { %791 = vst.msk [vmem:[%s371_s23 + $0x18] sm:$0xff] %vm787_vm4, %v1097_v38 }
 0x11b   : > { %v1099_v39 = vpop.eup %1098 }
 0x11c   : > { %792 = vst.msk [vmem:[%s371_s23 + $0x20] sm:$0xff] %vm787_vm4, %v1099_v39 }
 0x11d PF: > { %s17_s26 = sadd.s32 1, %s1122_s26   ;;  %s1351_s24 = smov %s1118_s25 }
 0x11e   : > { %p14_p5 = scmp.ge.s32.totalorder %s17_s26, 4   ;;  %s1352_s25 = smov %s1354_s27 }
 0x120   :  { %16 = sbr.rel (!%p14_p5) target bundleno = 2 (0x2), region = 84 }

</bundles_post_ra>
